<compile_context>
chip_gen: v7x
topology: tpu7x:2x2x1
jax: 0.10.0
libtpu: 0.0.40
codegen_flags: <defaults>
</compile_context>

<pallas_src>
import math

import jax
import jax.numpy as jnp
from jax.experimental import pallas as pl
from jax.experimental.pallas import tpu as pltpu


_TARGET_BLOCK_BYTES = 2 * 1024 * 1024   # ~2 MiB x-block: ~85%+ of HBM roofline, and
                                        # (in+out, double buffered) fits every
                                        # generation's default scoped VMEM (v5e 16 MiB,
                                        # v6e/v7x 32 MiB).
_MAX_BLOCK_ROWS = 1024                  # keep (rows, 1) pooled intermediates small
                                        # (they pad to 128 lanes in VMEM / vregs).


def _eca_kernel(x_ref, wm_ref, o_ref, pool_scr):
    """One block: rows = nb whole batch elements x C channels, lanes = L.

    x_ref   : (R, L)         input rows
    wm_ref  : (k, R, 1)      per-row conv weights, zeroed at channel-group edges
    o_ref   : (R, L)         output rows
    pool_scr: (R + 2*pad, 1) f32 VMEM staging for the pooled vector
    """
    rblk = x_ref.shape[0]
    k = wm_ref.shape[0]
    pad = k // 2

    # Adaptive average pool to length 1: per-row mean over L (lane reduction).
    pool = jnp.mean(x_ref[...].astype(jnp.float32), axis=-1, keepdims=True)   # (R, 1)

    # Stage the pooled vector with `pad` zero rows on each side so every conv tap
    # is an in-bounds, statically-offset read (zero padding at the block edges).
    pool_scr[...] = jnp.zeros_like(pool_scr)
    pool_scr[pl.ds(pad, rblk), :] = pool

    # k-tap channel conv: conv[r] = sum_j w[j] * pool[r + j - pad], with the weight
    # zeroed (via wm_ref) wherever the tap would cross a batch/channel-group
    # boundary.  The jnp.where also keeps any padded-tail garbage from leaking in.
    conv = jnp.zeros((rblk, 1), jnp.float32)
    for j in range(k):                        # k is tiny (3 or 5): static unroll
        wj = wm_ref[j]                        # (R, 1)
        tap = pool_scr[pl.ds(j, rblk), :]     # pool shifted by (j - pad)
        conv = conv + jnp.where(wj != 0.0, wj * tap, 0.0)

    attn = jax.nn.sigmoid(conv)               # (R, 1)

    # Re-read x from the ref so the slab streams load -> add -> store.
    # (For small L this store is lane-masked; for realistic L >= 128 it is
    #  lane-dense automatically since L sits on the lane axis.)
    o_ref[...] = attn.astype(o_ref.dtype) + x_ref[...]


def _masked_weights(conv_weight, c, nb):
    """(k, nb*c, 1) per-row weights implementing zero-padded conv over channels."""
    k = conv_weight.shape[0]
    pad = k // 2
    ch = jnp.tile(jnp.arange(c, dtype=jnp.int32), nb)            # (nb*c,) channel idx
    off = jnp.arange(k, dtype=jnp.int32)[:, None] - pad          # (k, 1) tap offsets
    tgt = ch[None, :] + off                                      # (k, nb*c)
    valid = (tgt >= 0) & (tgt < c)
    wm = jnp.where(valid, conv_weight.astype(jnp.float32)[:, None], 0.0)
    return wm[:, :, None]                                        # (k, nb*c, 1)


@jax.jit
def eca_forward(x, conv_weight):
    """x: (N, C, L).  conv_weight: (k,) Conv1d(1, 1, k, bias=False) weight."""
    n, c, l = x.shape
    k = conv_weight.shape[0]
    pad = k // 2
    itemsize = x.dtype.itemsize

    # Rows per block: whole batch elements, sized for double-buffered VMEM.
    per_batch_bytes = c * l * itemsize
    nb = int(min(n,
                 max(1, _TARGET_BLOCK_BYTES // per_batch_bytes),
                 max(1, _MAX_BLOCK_ROWS // c)))
    if nb < n:
        m = 8 // math.gcd(c, 8)              # keep the sublane block dim % 8 == 0
        nb = (nb // m) * m
        if nb == 0:
            nb = n                           # full extent is always a legal block
    rblk = nb * c
    r_total = n * c
    grid = (pl.cdiv(n, nb),)

    x2 = x.reshape(r_total, l)                      # free: row-major view
    wm = _masked_weights(conv_weight, c, nb)        # tiny, O(k*C) per block

    # TODO(synk): for very large C*L one (nb*C, L) slab can exceed VMEM (notably
    # v7x's 64 MiB); that case needs a two-phase (reduce over L tiles, then apply)
    # variant, not implemented here.
    out2 = pl.pallas_call(
        _eca_kernel,
        out_shape=jax.ShapeDtypeStruct((r_total, l), x.dtype),
        grid=grid,
        in_specs=[
            pl.BlockSpec((rblk, l), lambda i: (i, 0)),
            pl.BlockSpec((k, rblk, 1), lambda i: (0, 0, 0)),   # same tiny block every step
        ],
        out_specs=pl.BlockSpec((rblk, l), lambda i: (i, 0)),
        scratch_shapes=[pltpu.VMEM((rblk + 2 * pad, 1), jnp.float32)],
        compiler_params=pltpu.CompilerParams(
            dimension_semantics=("parallel",)),     # lets v7x shard blocks across its 2 TCs
        cost_estimate=pl.CostEstimate(
            flops=2 * n * c * l + 2 * k * n * c,
            transcendentals=n * c,
            bytes_accessed=2 * n * c * l * itemsize + k * rblk * 4),
    )(x2, wm)
    return out2.reshape(n, c, l)


def eca_reference(x, conv_weight):
    """Pure-JAX reference mirroring the PyTorch forward."""
    n, c, l = x.shape
    k = conv_weight.shape[0]
    pad = k // 2
    pool = x.mean(axis=-1)                                       # (N, C)
    pool_p = jnp.pad(pool, ((0, 0), (pad, pad)))
    conv = jnp.zeros_like(pool)
    for j in range(k):
        conv = conv + conv_weight[j] * pool_p[:, j:j + c]
    attn = jax.nn.sigmoid(conv)[:, :, None]                      # (N, C, 1)
    return attn + x


if __name__ == "__main__":
    # Module hyper-params: c channels, b=1, gamma=2 -> kernel size k.
    N, C, L = 2, 32, 16
    b, gamma = 1, 2
    t = int(abs((math.log(C, 2) + b) / gamma))
    K = t if t % 2 else t + 1                                    # C=32 -> k=3

    key = jax.random.PRNGKey(0)
    kx, kw = jax.random.split(key)
    x = jax.random.normal(kx, (N, C, L), dtype=jnp.float32)
    # Deterministic Conv1d(1,1,k,bias=False)-like weight init.
    bound = 1.0 / math.sqrt(K)
    conv_weight = jax.random.uniform(kw, (K,), dtype=jnp.float32,
                                     minval=-bound, maxval=bound)

    out = jax.block_until_ready(eca_forward(x, conv_weight))
    ref = eca_reference(x, conv_weight)
    assert out.shape == (N, C, L)
    assert jnp.allclose(out, ref, atol=1e-5, rtol=1e-5)
    print("KERNEL_OK")
</pallas_src>

<mosaic_0001>
module attributes {stable_mosaic.version = 11 : i64} {
  func.func @_eca_kernel(%arg0: i32, %arg1: memref<64x16xf32, #tpu.memory_space<vmem>>, %arg2: memref<3x64x1xf32, #tpu.memory_space<vmem>>, %arg3: memref<64x16xf32, #tpu.memory_space<vmem>>, %arg4: memref<66x1xf32, #tpu.memory_space<vmem>>) attributes {dimension_semantics = [#tpu.dimension_semantics<parallel>], iteration_bounds = array<i64: 1>, scalar_prefetch = 0 : i64, scratch_operands = 1 : i64, tpu.core_type = #tpu.core_type<tc>, window_params = [{transform_indices = @transform_0, window_bounds = array<i64: 64, 16>}, {pipeline_mode = #tpu.pipeline_mode<synchronous>, transform_indices = @transform_1, window_bounds = array<i64: 3, 64, 1>}, {transform_indices = @transform_2, window_bounds = array<i64: 64, 16>}]} {
    %c0 = arith.constant 0 : index
    %c0_0 = arith.constant 0 : index
    %0 = vector.load %arg1[%c0, %c0_0] : memref<64x16xf32, #tpu.memory_space<vmem>>, vector<64x16xf32>
    %cst = arith.constant dense<0.000000e+00> : vector<64xf32>
    %1 = vector.multi_reduction <add>, %0, %cst [1] : vector<64x16xf32> to vector<64xf32>
    %2 = vector.shape_cast %1 : vector<64xf32> to vector<64x1xf32>
    %cst_1 = arith.constant 1.600000e+01 : f32
    %3 = vector.broadcast %cst_1 : f32 to vector<64x1xf32>
    %4 = arith.divf %2, %3 : vector<64x1xf32>
    %cst_2 = arith.constant 0.000000e+00 : f32
    %5 = vector.broadcast %cst_2 : f32 to vector<66x1xf32>
    %c0_3 = arith.constant 0 : index
    %c0_4 = arith.constant 0 : index
    %6 = vector.load %arg4[%c0_3, %c0_4] : memref<66x1xf32, #tpu.memory_space<vmem>>, vector<66x1xf32>
    tpu.vector_store %arg4[%c0_3, %c0_4], %5 {strides = array<i32>} : memref<66x1xf32, #tpu.memory_space<vmem>>, vector<66x1xf32>,
    %c1 = arith.constant 1 : index
    %c0_5 = arith.constant 0 : index
    %7 = vector.load %arg4[%c1, %c0_5] : memref<66x1xf32, #tpu.memory_space<vmem>>, vector<64x1xf32>
    tpu.vector_store %arg4[%c1, %c0_5], %4 {strides = array<i32>} : memref<66x1xf32, #tpu.memory_space<vmem>>, vector<64x1xf32>,
    %cst_6 = arith.constant 0.000000e+00 : f32
    %8 = vector.broadcast %cst_6 : f32 to vector<64x1xf32>
    %c0_7 = arith.constant 0 : index
    %c0_8 = arith.constant 0 : index
    %c0_9 = arith.constant 0 : index
    %9 = vector.load %arg2[%c0_7, %c0_8, %c0_9] : memref<3x64x1xf32, #tpu.memory_space<vmem>>, vector<1x64x1xf32>
    %10 = vector.shape_cast %9 : vector<1x64x1xf32> to vector<64x1xf32>
    %c0_10 = arith.constant 0 : index
    %c0_11 = arith.constant 0 : index
    %11 = vector.load %arg4[%c0_10, %c0_11] : memref<66x1xf32, #tpu.memory_space<vmem>>, vector<64x1xf32>
    %cst_12 = arith.constant 0.000000e+00 : f32
    %12 = vector.broadcast %cst_12 : f32 to vector<64x1xf32>
    %13 = arith.cmpf one, %10, %12 : vector<64x1xf32>
    %14 = arith.mulf %10, %11 : vector<64x1xf32>
    %cst_13 = arith.constant 0.000000e+00 : f32
    %15 = vector.broadcast %cst_13 : f32 to vector<64x1xf32>
    %16 = arith.select %13, %14, %15 : vector<64x1xi1>, vector<64x1xf32>
    %17 = arith.addf %8, %16 : vector<64x1xf32>
    %c1_14 = arith.constant 1 : index
    %c0_15 = arith.constant 0 : index
    %c0_16 = arith.constant 0 : index
    %18 = vector.load %arg2[%c1_14, %c0_15, %c0_16] : memref<3x64x1xf32, #tpu.memory_space<vmem>>, vector<1x64x1xf32>
    %19 = vector.shape_cast %18 : vector<1x64x1xf32> to vector<64x1xf32>
    %c1_17 = arith.constant 1 : index
    %c0_18 = arith.constant 0 : index
    %20 = vector.load %arg4[%c1_17, %c0_18] : memref<66x1xf32, #tpu.memory_space<vmem>>, vector<64x1xf32>
    %cst_19 = arith.constant 0.000000e+00 : f32
    %21 = vector.broadcast %cst_19 : f32 to vector<64x1xf32>
    %22 = arith.cmpf one, %19, %21 : vector<64x1xf32>
    %23 = arith.mulf %19, %20 : vector<64x1xf32>
    %cst_20 = arith.constant 0.000000e+00 : f32
    %24 = vector.broadcast %cst_20 : f32 to vector<64x1xf32>
    %25 = arith.select %22, %23, %24 : vector<64x1xi1>, vector<64x1xf32>
    %26 = arith.addf %17, %25 : vector<64x1xf32>
    %c2 = arith.constant 2 : index
    %c0_21 = arith.constant 0 : index
    %c0_22 = arith.constant 0 : index
    %27 = vector.load %arg2[%c2, %c0_21, %c0_22] : memref<3x64x1xf32, #tpu.memory_space<vmem>>, vector<1x64x1xf32>
    %28 = vector.shape_cast %27 : vector<1x64x1xf32> to vector<64x1xf32>
    %c2_23 = arith.constant 2 : index
    %c0_24 = arith.constant 0 : index
    %29 = vector.load %arg4[%c2_23, %c0_24] : memref<66x1xf32, #tpu.memory_space<vmem>>, vector<64x1xf32>
    %cst_25 = arith.constant 0.000000e+00 : f32
    %30 = vector.broadcast %cst_25 : f32 to vector<64x1xf32>
    %31 = arith.cmpf one, %28, %30 : vector<64x1xf32>
    %32 = arith.mulf %28, %29 : vector<64x1xf32>
    %cst_26 = arith.constant 0.000000e+00 : f32
    %33 = vector.broadcast %cst_26 : f32 to vector<64x1xf32>
    %34 = arith.select %31, %32, %33 : vector<64x1xi1>, vector<64x1xf32>
    %35 = arith.addf %26, %34 : vector<64x1xf32>
    %36 = arith.negf %35 : vector<64x1xf32>
    %37 = math.exp %36 : vector<64x1xf32>
    %cst_27 = arith.constant 1.000000e+00 : f32
    %38 = vector.broadcast %cst_27 : f32 to vector<64x1xf32>
    %39 = arith.addf %38, %37 : vector<64x1xf32>
    %40 = arith.divf %38, %39 : vector<64x1xf32>
    %c0_28 = arith.constant 0 : index
    %c0_29 = arith.constant 0 : index
    %41 = vector.load %arg1[%c0_28, %c0_29] : memref<64x16xf32, #tpu.memory_space<vmem>>, vector<64x16xf32>
    %42 = vector.broadcast %40 : vector<64x1xf32> to vector<64x16xf32>
    %43 = arith.addf %42, %41 : vector<64x16xf32>
    %c0_30 = arith.constant 0 : index
    %c0_31 = arith.constant 0 : index
    %44 = vector.load %arg3[%c0_30, %c0_31] : memref<64x16xf32, #tpu.memory_space<vmem>>, vector<64x16xf32>
    tpu.vector_store %arg3[%c0_30, %c0_31], %43 {strides = array<i32>} : memref<64x16xf32, #tpu.memory_space<vmem>>, vector<64x16xf32>,
    return
  }
  func.func @transform_0(%arg0: i32) -> (i32, i32) {
    %c0_i32 = arith.constant 0 : i32
    %c0_i32_0 = arith.constant 0 : i32
    return %arg0, %c0_i32 : i32, i32
  }
  func.func @transform_1(%arg0: i32) -> (i32, i32, i32) {
    %c0_i32 = arith.constant 0 : i32
    %c0_i32_0 = arith.constant 0 : i32
    %c0_i32_1 = arith.constant 0 : i32
    %c0_i32_2 = arith.constant 0 : i32
    return %c0_i32, %c0_i32_0, %c0_i32_1 : i32, i32, i32
  }
  func.func @transform_2(%arg0: i32) -> (i32, i32) {
    %c0_i32 = arith.constant 0 : i32
    %c0_i32_0 = arith.constant 0 : i32
    return %arg0, %c0_i32 : i32, i32
  }
}

</mosaic_0001>

<bundles_post_ra>
// kernel: eca_forward.1
= control target key start
LH: loop header
LB: loop body
LE: loop exit
PB: predicated region body
PF: predicated region fallthrough
CT: control target
= control target key end

     0   :  { %vm721_vm0 = vcmask 130048   ;;  %vm53_vm1 = vcmask 7168   ;;  %v394_v3 = vmov 0.0   ;;  %vm62_vm2 = vcmask 1024   ;;  %s718_s0 = inlined_call_operand.vmem [shape: f32[64,16], index: 0, kind: input, shape index: {}]   ;;  %s719_s1 = inlined_call_operand.vmem [shape: f32[3,64,1], index: 1, kind: input, shape index: {}]   ;;  %s720_s2 = inlined_call_operand.vmem [shape: f32[64,16], index: 2, kind: output, shape index: {}]  }
   0x1   :  { %v414_v0 = vld [vmem:[%s718_s0] sm:$0xff]  ;;  %v419_v1 = vld [vmem:[%s718_s0 + $0x10] sm:$0xff]  ;;  %v424_v2 = vld [vmem:[%s718_s0 + $0x8] sm:$0xff]  ;;  %54 = vst.msk [vmem:[#allocation2] sm:$0xff] %vm53_vm1, %v394_v3  ;;  %v395_v17 = vmov 0  }
   0x2   :  { %55 = vst.msk [vmem:[#allocation2 + $0x8] sm:$0xff] %vm53_vm1, %v394_v3  ;;  %56 = vst.msk [vmem:[#allocation2 + $0x10] sm:$0xff] %vm53_vm1, %v394_v3  ;;  %v20_v4 = vsel %vm721_vm0, %v414_v0, 0.0  ;;  %v26_v5 = vsel %vm721_vm0, %v419_v1, 0.0  ;;  %v441_v6 = vld [vmem:[%s718_s0 + $0x18] sm:$0xff]  ;;  %v23_v7 = vsel %vm721_vm0, %v424_v2, 0.0  ;;  %360 = vset.pattern.permute.xlu0 %v395_v17  ;;  %361 = vset.pattern.permute.xlu1 %v395_v17 }
   0x3   :  { %57 = vst.msk [vmem:[#allocation2 + $0x18] sm:$0xff] %vm53_vm1, %v394_v3  ;;  %58 = vst.msk [vmem:[#allocation2 + $0x20] sm:$0xff] %vm53_vm1, %v394_v3  ;;  %21 = vadd.xlane.f32.xlu0 %v20_v4  ;;  %27 = vadd.xlane.f32.xlu1 %v26_v5  ;;  %v29_v8 = vsel %vm721_vm0, %v441_v6, 0.0  ;;  %v450_v9 = vld [vmem:[%s718_s0 + $0x20] sm:$0xff]  ;;  %v455_v10 = vld [vmem:[%s718_s0 + $0x28] sm:$0xff] }
   0x4   :  { %59 = vst.msk [vmem:[#allocation2 + $0x28] sm:$0xff] %vm53_vm1, %v394_v3  ;;  %60 = vst.msk [vmem:[#allocation2 + $0x30] sm:$0xff] %vm53_vm1, %v394_v3  ;;  %v32_v11 = vsel %vm721_vm0, %v450_v9, 0.0  ;;  %v35_v12 = vsel %vm721_vm0, %v455_v10, 0.0  ;;  %v464_v13 = vld [vmem:[%s718_s0 + $0x30] sm:$0xff]  ;;  %v469_v14 = vld [vmem:[%s718_s0 + $0x38] sm:$0xff] }
   0x5   :  { %61 = vst.msk [vmem:[#allocation2 + $0x38] sm:$0xff] %vm53_vm1, %v394_v3  ;;  %v38_v15 = vsel %vm721_vm0, %v464_v13, 0.0  ;;  %v41_v16 = vsel %vm721_vm0, %v469_v14, 0.0  ;;  %v72_v26 = vld [vmem:[%s719_s1] sm:$0xff]  ;;  %v491_v29 = vld [vmem:[%s719_s1 + $0x8] sm:$0xff]  ;;  %v508_v32 = vld [vmem:[%s719_s1 + $0x10] sm:$0xff] }
   0x6   :  { %63 = vst.msk [vmem:[#allocation2 + $0x40] sm:$0x3] %vm62_vm2, %v394_v3  ;;  %v334_v27 = vld [vmem:[%s719_s1 + $0x40] sm:$0xff]  ;;  %v498_v30 = vld [vmem:[%s719_s1 + $0x48] sm:$0xff]  ;;  %vm88_vm3 = vcmp.ne.f32.partialorder %v72_v26, 0.0  ;;  %v336_v35 = vld [vmem:[%s719_s1 + $0x50] sm:$0xff] }
   0x7   :  { %24 = vadd.xlane.f32.xlu0 %v23_v7  ;;  %30 = vadd.xlane.f32.xlu1 %v29_v8  ;;  %v486_v28 = vld [vmem:[%s719_s1 + $0x80] sm:$0xff]  ;;  %v503_v31 = vld [vmem:[%s719_s1 + $0x88] sm:$0xff]  ;;  %vm137_vm4 = vcmp.ne.f32.partialorder %v334_v27, 0.0  ;;  %v517_v36 = vld [vmem:[%s719_s1 + $0x90] sm:$0xff]  ;;  %vm89_vm6 = vcmp.ne.f32.partialorder %v491_v29, 0.0  ;;  %vm138_vm7 = vcmp.ne.f32.partialorder %v498_v30, 0.0 }
   0x8   :  { %vm186_vm5 = vcmp.ne.f32.partialorder %v486_v28, 0.0  ;;  %v522_v37 = vld [vmem:[%s719_s1 + $0x18] sm:$0xff]  ;;  %v538_v42 = vld [vmem:[%s719_s1 + $0x20] sm:$0xff]  ;;  %vm187_vm8 = vcmp.ne.f32.partialorder %v503_v31, 0.0  ;;  %vm90_vm9 = vcmp.ne.f32.partialorder %v508_v32, 0.0  ;;  %vm139_vm10 = vcmp.ne.f32.partialorder %v336_v35, 0.0 }
   0x9   :  { %v528_v40 = vld [vmem:[%s719_s1 + $0x58] sm:$0xff]  ;;  %vm188_vm11 = vcmp.ne.f32.partialorder %v517_v36, 0.0  ;;  %v549_v48 = vld [vmem:[%s719_s1 + $0x60] sm:$0xff]  ;;  %v559_v50 = vld [vmem:[%s719_s1 + $0x28] sm:$0xff]  ;;  %vm91_vm12 = vcmp.ne.f32.partialorder %v522_v37, 0.0  ;;  %vm92_vm15 = vcmp.ne.f32.partialorder %v538_v42, 0.0 }
   0xa   :  { %v533_v41 = vld [vmem:[%s719_s1 + $0x98] sm:$0xff]  ;;  %v554_v49 = vld [vmem:[%s719_s1 + $0xa0] sm:$0xff]  ;;  %vm140_vm13 = vcmp.ne.f32.partialorder %v528_v40, 0.0  ;;  %v567_v54 = vld [vmem:[%s719_s1 + $0x68] sm:$0xff]  ;;  %vm141_vm2 = vcmp.ne.f32.partialorder %v549_v48, 0.0 }
   0xb   :  { %33 = vadd.xlane.f32.xlu0 %v32_v11  ;;  %36 = vadd.xlane.f32.xlu1 %v35_v12  ;;  %vm189_vm14 = vcmp.ne.f32.partialorder %v533_v41, 0.0  ;;  %v572_v55 = vld [vmem:[%s719_s1 + $0xa8] sm:$0xff]  ;;  %v577_v56 = vld [vmem:[%s719_s1 + $0x30] sm:$0xff] }
   0xc   :  { %v584_v61 = vld [vmem:[%s719_s1 + $0x70] sm:$0xff]  ;;  %vm191_vm0 = vcmp.ne.f32.partialorder %v572_v55, 0.0 }
   0xd   :  { %v589_v62 = vld [vmem:[%s719_s1 + $0xb0] sm:$0xff] }
   0xf   :  { %39 = vadd.xlane.f32.xlu0 %v38_v15  ;;  %42 = vadd.xlane.f32.xlu1 %v41_v16 }
  0x90   :  { %v22_v18 = vpop.xlane.xlu0 %21  ;;  %v28_v19 = vpop.xlane.xlu1 %27 }
  0x91   :  { %v45_v20 = vmul.f32 0.0625, %v22_v18  ;;  %v47_v21 = vmul.f32 0.0625, %v28_v19 }
  0x93   :  { %64 = vst.msk [vmem:[#allocation2 + $0x1] sm:$0xff] %vm53_vm1, %v45_v20  ;;  %66 = vst.msk [vmem:[#allocation2 + $0x11] sm:$0xff] %vm53_vm1, %v47_v21 }
  0x94   :  { %v25_v22 = vpop.xlane.xlu0 %24  ;;  %v31_v23 = vpop.xlane.xlu1 %30 }
  0x95   :  { %v46_v24 = vmul.f32 0.0625, %v25_v22  ;;  %v48_v25 = vmul.f32 0.0625, %v31_v23 }
  0x97   :  { %65 = vst.msk [vmem:[#allocation2 + $0x9] sm:$0xff] %vm53_vm1, %v46_v24  ;;  %67 = vst.msk [vmem:[#allocation2 + $0x19] sm:$0xff] %vm53_vm1, %v48_v25 }
  0x98   :  { %v34_v33 = vpop.xlane.xlu0 %33  ;;  %v37_v34 = vpop.xlane.xlu1 %36 }
  0x99   :  { %v49_v38 = vmul.f32 0.0625, %v34_v33  ;;  %v50_v39 = vmul.f32 0.0625, %v37_v34 }
  0x9a   :  { %v80_v43 = vld [vmem:[#allocation2] sm:$0xff]  ;;  %v131_v45 = vld [vmem:[#allocation2 + $0x11] sm:$0xff] }
  0x9b   :  { %v129_v44 = vld [vmem:[#allocation2 + $0x1] sm:$0xff]  ;;  %68 = vst.msk [vmem:[#allocation2 + $0x21] sm:$0xff] %vm53_vm1, %v49_v38  ;;  %69 = vst.msk [vmem:[#allocation2 + $0x29] sm:$0xff] %vm53_vm1, %v50_v39  ;;  %v96_v46 = vmul.f32 %v80_v43, %v72_v26  ;;  %v147_v53 = vmul.f32 %v336_v35, %v131_v45 }
  0x9c   :  { %v145_v47 = vmul.f32 %v334_v27, %v129_v44  ;;  %v40_v51 = vpop.xlane.xlu0 %39  ;;  %v43_v52 = vpop.xlane.xlu1 %42  ;;  %v618_v27 = vld [vmem:[%s719_s1 + $0x38] sm:$0xff] }
  0x9d   :  { %v51_v57 = vmul.f32 0.0625, %v40_v51  ;;  %v52_v58 = vmul.f32 0.0625, %v43_v52  ;;  %v104_v59 = vsel %vm88_vm3, %v96_v46, 0.0  ;;  %v155_v19 = vsel %vm139_vm10, %v147_v53, 0.0 }
  0x9e   :  { %v153_v60 = vsel %vm137_vm4, %v145_v47, 0.0  ;;  %v178_v63 = vld [vmem:[#allocation2 + $0x2] sm:$0xff]  ;;  %v179_v12 = vld [vmem:[#allocation2 + $0xa] sm:$0xff]  ;;  %v180_v16 = vld [vmem:[#allocation2 + $0x12] sm:$0xff]  ;;  %vm93_vm4 = vcmp.ne.f32.partialorder %v559_v50, 0.0  ;;  %vm94_vm3 = vcmp.ne.f32.partialorder %v577_v56, 0.0 }
  0x9f   :  { %v81_v3 = vld [vmem:[#allocation2 + $0x8] sm:$0xff]  ;;  %70 = vst.msk [vmem:[#allocation2 + $0x31] sm:$0xff] %vm53_vm1, %v51_v57  ;;  %71 = vst.msk [vmem:[#allocation2 + $0x39] sm:$0xff] %vm53_vm1, %v52_v58  ;;  %v161_v5 = vadd.f32 %v153_v60, %v104_v59  ;;  %v194_v7 = vmul.f32 %v486_v28, %v178_v63  ;;  %v82_v15 = vld [vmem:[#allocation2 + $0x10] sm:$0xff]  ;;  %v195_v17 = vmul.f32 %v503_v31, %v179_v12  ;;  %vm142_vm1 = vcmp.ne.f32.partialorder %v567_v54, 0.0 }
  0xa0   :  { %v130_v4 = vld [vmem:[#allocation2 + $0x9] sm:$0xff]  ;;  %v97_v8 = vmul.f32 %v81_v3, %v491_v29  ;;  %v98_v18 = vmul.f32 %v82_v15, %v508_v32  ;;  %v196_v20 = vmul.f32 %v517_v36, %v180_v16  ;;  %v83_v21 = vld [vmem:[#allocation2 + $0x18] sm:$0xff]  ;;  %vm143_vm10 = vcmp.ne.f32.partialorder %v584_v61, 0.0 }
  0xa1   :  { %v146_v11 = vmul.f32 %v498_v30, %v130_v4  ;;  %v132_v22 = vld [vmem:[#allocation2 + $0x19] sm:$0xff]  ;;  %v202_v23 = vsel %vm186_vm5, %v194_v7, 0.0  ;;  %v99_v26 = vmul.f32 %v83_v21, %v522_v37  ;;  %v203_v30 = vsel %vm187_vm8, %v195_v17, 0.0 }
  0xa2   :  { %v105_v24 = vsel %vm89_vm6, %v97_v8, 0.0  ;;  %v623_v28 = vld [vmem:[%s719_s1 + $0x78] sm:$0xff]  ;;  %v210_v33 = vadd.f32 %v202_v23, %v161_v5  ;;  %v106_v34 = vsel %vm90_vm9, %v98_v18, 0.0  ;;  %v84_v38 = vld [vmem:[#allocation2 + $0x20] sm:$0xff]  ;;  %vm192_vm5 = vcmp.ne.f32.partialorder %v589_v62, 0.0  ;;  %v85_v58 = vld [vmem:[#allocation2 + $0x28] sm:$0xff] }
  0xa3   :  { %v154_v25 = vsel %vm138_vm7, %v146_v11, 0.0  ;;  %v181_v35 = vld [vmem:[#allocation2 + $0x1a] sm:$0xff]  ;;  %v163_v43 = vadd.f32 %v155_v19, %v106_v34  ;;  %v204_v44 = vsel %vm188_vm11, %v196_v20, 0.0  ;;  %v107_v45 = vsel %vm91_vm12, %v99_v26, 0.0  ;;  %v182_v47 = vld [vmem:[#allocation2 + $0x22] sm:$0xff] }
  0xa4   :  { %v162_v29 = vadd.f32 %v154_v25, %v105_v24  ;;  %v133_v39 = vld [vmem:[#allocation2 + $0x21] sm:$0xff]  ;;  %v148_v46 = vmul.f32 %v528_v40, %v132_v22  ;;  %v350_v31 = vmul.f32 -1.442695, %v210_v33  ;;  %v197_v32 = vmul.f32 %v533_v41, %v181_v35  ;;  %v134_v3 = vld [vmem:[#allocation2 + $0x29] sm:$0xff] }
  0xa5   :  { %v100_v52 = vmul.f32 %v84_v38, %v538_v42  ;;  %vm95_vm6 = vcmp.ne.f32.partialorder %v618_v27, 0.0  ;;  %vm144_vm7 = vcmp.ne.f32.partialorder %v623_v28, 0.0  ;;  %v212_v53 = vadd.f32 %v204_v44, %v163_v43 }
  0xa6   :  { %v211_v51 = vadd.f32 %v203_v30, %v162_v29  ;;  %v156_v36 = vsel %vm140_vm13, %v148_v46, 0.0  ;;  %v149_v37 = vmul.f32 %v549_v48, %v133_v39  ;;  %v198_v57 = vmul.f32 %v554_v49, %v182_v47  ;;  %v183_v4 = vld [vmem:[#allocation2 + $0x2a] sm:$0xff]  ;;  %v184_v17 = vld [vmem:[#allocation2 + $0x32] sm:$0xff]  ;;  %v185_v29 = vld [vmem:[#allocation2 + $0x3a] sm:$0xff] }
  0xa7   :  { %362 = vpow2.f32 %v350_v31  ;;  %v164_v60 = vadd.f32 %v156_v36, %v107_v45  ;;  %v205_v63 = vsel %vm189_vm14, %v197_v32, 0.0  ;;  %v86_v5 = vld [vmem:[#allocation2 + $0x30] sm:$0xff]  ;;  %v352_v7 = vmul.f32 -1.442695, %v212_v53  ;;  %v87_v22 = vld [vmem:[#allocation2 + $0x38] sm:$0xff] }
  0xa8   :  { %v351_v59 = vmul.f32 -1.442695, %v211_v51  ;;  %v108_v8 = vsel %vm92_vm15, %v100_v52, 0.0  ;;  %v157_v40 = vsel %vm141_vm2, %v149_v37, 0.0  ;;  %vm722_vm8 = vcmp.ne.f32.partialorder %v554_v49, 0.0  ;;  %v135_v12 = vld [vmem:[#allocation2 + $0x31] sm:$0xff] }
  0xa9   :  { %v206_v11 = vsel %vm722_vm8, %v198_v57, 0.0  ;;  %v213_v15 = vadd.f32 %v205_v63, %v164_v60  ;;  %v165_v16 = vadd.f32 %v157_v40, %v108_v8  ;;  %v101_v41 = vmul.f32 %v85_v58, %v559_v50  ;;  %v136_v23 = vld [vmem:[#allocation2 + $0x39] sm:$0xff] }
  0xaa   :  { %364 = vpow2.f32 %v351_v59  ;;  %v150_v18 = vmul.f32 %v567_v54, %v134_v3  ;;  %v199_v19 = vmul.f32 %v572_v55, %v183_v4  ;;  %v102_v42 = vmul.f32 %v86_v5, %v577_v56  ;;  %v349_v50 = vld [vmem:[%s719_s1 + $0xb8] sm:$0xff] }
  0xab   :  { %366 = vpow2.f32 %v352_v7  ;;  %v353_v20 = vmul.f32 -1.442695, %v213_v15  ;;  %v214_v48 = vadd.f32 %v206_v11, %v165_v16  ;;  %v109_v49 = vsel %vm93_vm4, %v101_v41, 0.0 }
  0xac   :  { %v151_v21 = vmul.f32 %v584_v61, %v135_v12  ;;  %v158_v24 = vsel %vm142_vm1, %v150_v18, 0.0  ;;  %v207_v25 = vsel %vm191_vm0, %v199_v19, 0.0  ;;  %v110_v26 = vsel %vm94_vm3, %v102_v42, 0.0 }
  0xad   :  { %v200_v33 = vmul.f32 %v589_v62, %v184_v17  ;;  %368 = vpow2.f32 %v353_v20  ;;  %v354_v30 = vmul.f32 -1.442695, %v214_v48  ;;  %v166_v34 = vadd.f32 %v158_v24, %v109_v49 }
  0xae   :  { %v159_v54 = vsel %vm143_vm10, %v151_v21, 0.0  ;;  %v103_v56 = vmul.f32 %v87_v22, %v618_v27  ;;  %v152_v38 = vmul.f32 %v623_v28, %v136_v23  ;;  %vm193_vm0 = vcmp.ne.f32.partialorder %v349_v50, 0.0 }
  0xaf   :  { %v167_v35 = vadd.f32 %v159_v54, %v110_v26  ;;  %v208_v55 = vsel %vm192_vm5, %v200_v33, 0.0  ;;  %v215_v39 = vadd.f32 %v207_v25, %v166_v34  ;;  %v201_v43 = vmul.f32 %v349_v50, %v185_v29 }
  0xb0   :  { %v111_v44 = vsel %vm95_vm6, %v103_v56, 0.0  ;;  %v160_v45 = vsel %vm144_vm7, %v152_v38, 0.0  ;;  %370 = vpow2.f32 %v354_v30  ;;  %vm723_vm9 = vcmask 130048  }
  0xb1   :  { %v363_v46 = vpop.eup %362  ;;  %v355_v61 = vmul.f32 -1.442695, %v215_v39  ;;  %v216_v47 = vadd.f32 %v208_v55, %v167_v35  ;;  %v168_v31 = vadd.f32 %v160_v45, %v111_v44  ;;  %v209_v51 = vsel %vm193_vm0, %v201_v43, 0.0  ;;  %vm724_vm11 = vmmov %vm723_vm9 }
  0xb2   :  { %v242_v62 = vadd.f32 1.0, %v363_v46  ;;  %vm725_vm12 = vmmov %vm723_vm9 }
  0xb3   :  { %v356_v36 = vmul.f32 -1.442695, %v216_v47  ;;  %v217_v37 = vadd.f32 %v209_v51, %v168_v31  ;;  %vm726_vm13 = vmmov %vm723_vm9 }
  0xb4   :  { %v365_v32 = vpop.eup %364  ;;  %372 = vrcp.f32 %v242_v62  ;;  %vm727_vm14 = vmmov %vm723_vm9 }
  0xb5   :  { %v367_v52 = vpop.eup %366  ;;  %v243_v53 = vadd.f32 1.0, %v365_v32  ;;  %374 = vpow2.f32 %v355_v61  ;;  %v357_v28 = vmul.f32 -1.442695, %v217_v37  ;;  %vm728_vm15 = vmmov %vm723_vm9 }
  0xb6   :  { %v244_v27 = vadd.f32 1.0, %v367_v52  ;;  %vm729_vm2 = vmmov %vm723_vm9 }
  0xb7   :  { %376 = vrcp.f32 %v243_v53  ;;  %v369_v57 = vpop.eup %368  ;;  %vm730_vm3 = vmmov %vm729_vm2 }
  0xb8   :  { %378 = vpow2.f32 %v356_v36  ;;  %v245_v58 = vadd.f32 1.0, %v369_v57 }
  0xb9   :  { %380 = vrcp.f32 %v244_v27 }
  0xba   :  { %v371_v59 = vpop.eup %370  ;;  %382 = vpow2.f32 %v357_v28 }
  0xbb   :  { %384 = vrcp.f32 %v245_v58  ;;  %v246_v63 = vadd.f32 1.0, %v371_v59 }
  0xbd   :  { %386 = vrcp.f32 %v246_v63 }
  0xbe   :  { %v373_v60 = vpop.eup %372 }
  0xbf   :  { %v375_v3 = vpop.eup %374  ;;  %276 = vperm.xlu0 %360, %v373_v60  }
  0xc0   :  { %v247_v5 = vadd.f32 1.0, %v375_v3 }
  0xc1   :  { %v377_v4 = vpop.eup %376 }
  0xc2   :  { %281 = vperm.xlu1 %361, %v377_v4   ;;  %v379_v7 = vpop.eup %378  ;;  %388 = vrcp.f32 %v247_v5 }
  0xc3   :  { %v381_v8 = vpop.eup %380  ;;  %v248_v40 = vadd.f32 1.0, %v379_v7 }
  0xc4   :  { %v383_v11 = vpop.eup %382 }
  0xc5   :  { %v385_v12 = vpop.eup %384  ;;  %390 = vrcp.f32 %v248_v40  ;;  %v249_v15 = vadd.f32 1.0, %v383_v11 }
  0xc6   :  { %286 = vperm.xlu1 %361, %v381_v8  }
  0xc7   :  { %v387_v16 = vpop.eup %386  ;;  %392 = vrcp.f32 %v249_v15 }
  0xca   :  { %291 = vperm.xlu1 %361, %v385_v12  }
  0xcc   :  { %v389_v41 = vpop.eup %388 }
  0xce   :  { %296 = vperm.xlu1 %361, %v387_v16  }
  0xcf   :  { %v391_v17 = vpop.eup %390 }
  0xd1   :  { %v393_v18 = vpop.eup %392 }
  0xd2   :  { %301 = vperm.xlu1 %361, %v389_v41  }
  0xd6   :  { %306 = vperm.xlu1 %361, %v391_v17  }
  0xda   :  { %311 = vperm.xlu1 %361, %v393_v18  }
 0x13e   :  { %v277_v19 = vpop.permute.xlu0 %276 }
 0x13f   :  { %v314_v42 = vadd.f32 %v277_v19, %v414_v0 }
 0x141   :  { %v282_v20 = vpop.permute.xlu1 %281  ;;  %322 = vst.msk [vmem:[%s720_s2] sm:$0xff] %vm723_vm9, %v314_v42 }
 0x142   :  { %v315_v48 = vadd.f32 %v282_v20, %v424_v2 }
 0x144   :  { %323 = vst.msk [vmem:[%s720_s2 + $0x8] sm:$0xff] %vm724_vm11, %v315_v48 }
 0x145   :  { %v287_v49 = vpop.permute.xlu1 %286 }
 0x146   :  { %v316_v21 = vadd.f32 %v287_v49, %v419_v1 }
 0x148   :  { %324 = vst.msk [vmem:[%s720_s2 + $0x10] sm:$0xff] %vm725_vm12, %v316_v21 }
 0x149   :  { %v292_v0 = vpop.permute.xlu1 %291 }
 0x14a   :  { %v317_v22 = vadd.f32 %v292_v0, %v441_v6 }
 0x14c   :  { %325 = vst.msk [vmem:[%s720_s2 + $0x18] sm:$0xff] %vm726_vm13, %v317_v22 }
 0x14d   :  { %v297_v2 = vpop.permute.xlu1 %296 }
 0x14e   :  { %v318_v23 = vadd.f32 %v297_v2, %v450_v9 }
 0x150   :  { %326 = vst.msk [vmem:[%s720_s2 + $0x20] sm:$0xff] %vm727_vm14, %v318_v23 }
 0x151   :  { %v302_v1 = vpop.permute.xlu1 %301 }
 0x152   :  { %v319_v24 = vadd.f32 %v302_v1, %v455_v10 }
 0x154   :  { %327 = vst.msk [vmem:[%s720_s2 + $0x28] sm:$0xff] %vm728_vm15, %v319_v24 }
 0x155   :  { %v307_v6 = vpop.permute.xlu1 %306 }
 0x156   :  { %v320_v25 = vadd.f32 %v307_v6, %v464_v13 }
 0x158   :  { %328 = vst.msk [vmem:[%s720_s2 + $0x30] sm:$0xff] %vm729_vm2, %v320_v25 }
 0x159   :  { %v312_v9 = vpop.permute.xlu1 %311 }
 0x15a   :  { %v321_v26 = vadd.f32 %v312_v9, %v469_v14 }
 0x15c   :  { %329 = vst.msk [vmem:[%s720_s2 + $0x38] sm:$0xff] %vm730_vm3, %v321_v26 }

</bundles_post_ra>
